<compile_context>
chip_gen: v7x
topology: tpu7x:2x2x1
jax: 0.10.0
libtpu: 0.0.40
codegen_flags: <defaults>
</compile_context>

<pallas_src>
import jax
import jax.numpy as jnp
from jax import lax
from jax.experimental import pallas as pl
from jax.experimental.pallas import tpu as pltpu

_LANES = 128
_TR_MAX = 4096  # rows per streamed tile (2 MiB per f32 input tile)


def _sublane_multiple(dtype) -> int:
    """Minimum sublane multiple for a dtype's native TPU tiling."""
    bits = jnp.dtype(dtype).itemsize * 8
    return max(8, 256 // bits)  # 8 for 32-bit, 16 for 16-bit, 32 for 8-bit


def _make_bce_kernel(n: int, tr: int, ar: int, needs_mask: bool):
    """Factory for the tiled BCE-with-logits partial-sum kernel (all args static)."""
    full_rows = n // _LANES   # number of fully-valid 128-lane rows
    rem = n % _LANES          # valid lanes in the (single) partial row
    groups = tr // ar         # rows folded into each accumulator row per tile

    def kernel(pwm1_ref, x_ref, y_ref, acc_ref):
        i = pl.program_id(0)

        @pl.when(i == 0)
        def _init():
            acc_ref[...] = jnp.zeros_like(acc_ref)

        # Cast in-kernel so HBM traffic stays in the input dtype (e.g. bf16 / bool).
        x = x_ref[...].astype(jnp.float32)
        y = y_ref[...].astype(jnp.float32)
        pwm1 = pwm1_ref[0]  # pos_weight - 1, precomputed on host (SMEM scalar)

        # PyTorch BCEWithLogitsLoss, numerically-stable form:
        #   l = (1 - y) * x + (1 + (pw - 1) * y) * (log1p(exp(-|x|)) + max(-x, 0))
        log_weight = 1.0 + pwm1 * y
        loss = (1.0 - y) * x + log_weight * (
            jnp.log1p(jnp.exp(-jnp.abs(x))) + jnp.maximum(-x, 0.0))

        def _accumulate(vals):
            # (tr,128) -> (ar,128): plain VPU adds across `groups` independent
            # accumulator rows; no per-step cross-lane (XLU) reduction.
            acc_ref[...] += vals.reshape(groups, ar, _LANES).sum(axis=0)

        if needs_mask:
            is_edge = i == pl.num_programs(0) - 1

            @pl.when(jnp.logical_not(is_edge))
            def _interior():          # interior tiles: zero masking cost
                _accumulate(loss)

            @pl.when(is_edge)
            def _edge():              # edge tile: mask pad / partial-row / OOB rows
                grow = i * tr + lax.broadcasted_iota(jnp.int32, (tr, _LANES), 0)
                lane = lax.broadcasted_iota(jnp.int32, (tr, _LANES), 1)
                valid = grow < full_rows
                if rem:
                    valid = valid | ((grow == full_rows) & (lane < rem))
                _accumulate(jnp.where(valid, loss, 0.0))
        else:
            _accumulate(loss)

    return kernel


def simple_loss(ypred, ytgt, pos_weight):
    """BCEWithLogitsLoss(pos_weight=[pos_weight]) with mean reduction."""
    assert ypred.shape == ytgt.shape
    n = int(ypred.size)

    sub = max(_sublane_multiple(ypred.dtype), _sublane_multiple(ytgt.dtype))
    x_flat = ypred.reshape(-1)
    y_flat = ytgt.reshape(-1)
    pad = (-n) % (sub * _LANES)
    if pad:  # only touch data when the flat size isn't (sub,128)-aligned
        x_flat = jnp.pad(x_flat, (0, pad))
        y_flat = jnp.pad(y_flat, (0, pad))
    rows = (n + pad) // _LANES          # multiple of `sub`

    tr = min(_TR_MAX, rows)             # tile rows (multiple of `sub`; 4096 is)
    nb = (rows + tr - 1) // tr          # number of (tr,128) tiles (streaming axis)

    # Accumulator rows: widest power-of-two divisor of tr (breaks the add chain).
    ar = 8
    for cand in (64, 32, 16, 8):
        if tr % cand == 0:
            ar = cand
            break

    # True iff any pad element / partial lane row / block-overshoot row exists.
    needs_mask = (nb * tr * _LANES != n)

    x2 = x_flat.reshape(rows, _LANES)
    y2 = y_flat.reshape(rows, _LANES)
    pwm1 = (jnp.asarray(pos_weight, dtype=jnp.float32) - 1.0).reshape(1)

    kernel = _make_bce_kernel(n=n, tr=tr, ar=ar, needs_mask=needs_mask)

    acc = pl.pallas_call(
        kernel,
        out_shape=jax.ShapeDtypeStruct((ar, _LANES), jnp.float32),
        grid_spec=pltpu.PrefetchScalarGridSpec(
            num_scalar_prefetch=1,            # pwm1 -> SMEM, passed to index_maps
            grid=(nb,),
            in_specs=[
                pl.BlockSpec((tr, _LANES), lambda i, pw: (i, 0)),
                pl.BlockSpec((tr, _LANES), lambda i, pw: (i, 0)),
            ],
            out_specs=pl.BlockSpec((ar, _LANES), lambda i, pw: (0, 0)),
        ),
        compiler_params=pltpu.CompilerParams(
            dimension_semantics=("arbitrary",)),  # resident accumulator axis
    )(pwm1, x2, y2)

    return jnp.sum(acc) / jnp.float32(n)


def _reference(ypred, ytgt, pos_weight):
    x = ypred.astype(jnp.float32)
    y = ytgt.astype(jnp.float32)
    log_weight = 1.0 + (pos_weight - 1.0) * y
    loss = (1.0 - y) * x + log_weight * (jnp.log1p(jnp.exp(-jnp.abs(x))) +
                                         jnp.maximum(-x, 0.0))
    return jnp.mean(loss)


if __name__ == "__main__":
    pos_weight = 2.13  # deterministic "parameter" from __init__
    key = jax.random.PRNGKey(0)

    # Primary small case consistent with the module's forward (elementwise loss),
    # size 2048 -> single aligned tile, no masking path.
    k1, k2 = jax.random.split(key)
    shape = (2, 4, 16, 16)
    ypred = jax.random.normal(k1, shape, dtype=jnp.float32)
    ytgt = (jax.random.uniform(k2, shape) > 0.5).astype(jnp.float32)
    out = jax.block_until_ready(simple_loss(ypred, ytgt, pos_weight))
    ref = _reference(ypred, ytgt, pos_weight)
    assert jnp.allclose(out, ref, atol=1e-5, rtol=1e-5), (out, ref)

    # Unaligned size -> exercises pad + the edge-tile-only masking branch.
    k3, k4 = jax.random.split(k1)
    shape2 = (3, 5, 7)
    yp2 = jax.random.normal(k3, shape2, dtype=jnp.float32)
    yt2 = (jax.random.uniform(k4, shape2) > 0.5).astype(jnp.float32)
    out2 = jax.block_until_ready(simple_loss(yp2, yt2, pos_weight))
    ref2 = _reference(yp2, yt2, pos_weight)
    assert jnp.allclose(out2, ref2, atol=1e-5, rtol=1e-5), (out2, ref2)

    # Larger case -> multi-tile streaming accumulation with unmasked interior tiles
    # and a masked (non-divisible) edge tile.
    k5, k6 = jax.random.split(k2)
    shape3 = (5, 8, 128, 128)
    yp3 = jax.random.normal(k5, shape3, dtype=jnp.float32)
    yt3 = (jax.random.uniform(k6, shape3) > 0.5).astype(jnp.float32)
    out3 = jax.block_until_ready(simple_loss(yp3, yt3, pos_weight))
    ref3 = _reference(yp3, yt3, pos_weight)
    assert jnp.allclose(out3, ref3, atol=1e-4, rtol=1e-4), (out3, ref3)

    print("KERNEL_OK")
</pallas_src>

<mosaic_0001>
module attributes {stable_mosaic.version = 11 : i64} {
  func.func @kernel(%arg0: i32, %arg1: memref<1xf32, #tpu.memory_space<smem>>, %arg2: memref<16x128xf32, #tpu.memory_space<vmem>>, %arg3: memref<16x128xf32, #tpu.memory_space<vmem>>, %arg4: memref<16x128xf32, #tpu.memory_space<vmem>>) attributes {dimension_semantics = [#tpu.dimension_semantics<arbitrary>], iteration_bounds = array<i64: 1>, scalar_prefetch = 1 : i64, scratch_operands = 0 : i64, tpu.core_type = #tpu.core_type<tc>, window_params = [{transform_indices = @transform_0, window_bounds = array<i64: 16, 128>}, {transform_indices = @transform_1, window_bounds = array<i64: 16, 128>}, {pipeline_mode = #tpu.pipeline_mode<synchronous>, transform_indices = @transform_2, window_bounds = array<i64: 16, 128>}]} {
    %c0_i32 = arith.constant 0 : i32
    %0 = arith.cmpi eq, %arg0, %c0_i32 : i32
    %1 = arith.extui %0 : i1 to i32
    %c0_i32_0 = arith.constant 0 : i32
    %2 = arith.cmpi ne, %1, %c0_i32_0 : i32
    scf.if %2 {
      %cst_14 = arith.constant 0.000000e+00 : f32
      %30 = vector.broadcast %cst_14 : f32 to vector<16x128xf32>
      %c0_15 = arith.constant 0 : index
      %c0_16 = arith.constant 0 : index
      %31 = vector.load %arg4[%c0_15, %c0_16] : memref<16x128xf32, #tpu.memory_space<vmem>>, vector<16x128xf32>
      tpu.vector_store %arg4[%c0_15, %c0_16], %30 {strides = array<i32>} : memref<16x128xf32, #tpu.memory_space<vmem>>, vector<16x128xf32>,
    } else {
    }
    %c0 = arith.constant 0 : index
    %c0_1 = arith.constant 0 : index
    %3 = vector.load %arg2[%c0, %c0_1] : memref<16x128xf32, #tpu.memory_space<vmem>>, vector<16x128xf32>
    %c0_2 = arith.constant 0 : index
    %c0_3 = arith.constant 0 : index
    %4 = vector.load %arg3[%c0_2, %c0_3] : memref<16x128xf32, #tpu.memory_space<vmem>>, vector<16x128xf32>
    %c0_4 = arith.constant 0 : index
    %5 = memref.load %arg1[%c0_4] : memref<1xf32, #tpu.memory_space<smem>>
    %6 = vector.broadcast %5 : f32 to vector<16x128xf32>
    %7 = arith.mulf %6, %4 : vector<16x128xf32>
    %cst = arith.constant 1.000000e+00 : f32
    %8 = vector.broadcast %cst : f32 to vector<16x128xf32>
    %9 = arith.addf %8, %7 : vector<16x128xf32>
    %cst_5 = arith.constant 1.000000e+00 : f32
    %10 = vector.broadcast %cst_5 : f32 to vector<16x128xf32>
    %11 = arith.subf %10, %4 : vector<16x128xf32>
    %12 = arith.mulf %11, %3 : vector<16x128xf32>
    %13 = math.absf %3 : vector<16x128xf32>
    %cst_6 = arith.constant 0.000000e+00 : f32
    %14 = vector.broadcast %cst_6 : f32 to vector<16x128xf32>
    %15 = arith.subf %14, %13 : vector<16x128xf32>
    %16 = math.exp %15 : vector<16x128xf32>
    %17 = math.log1p %16 : vector<16x128xf32>
    %cst_7 = arith.constant 0.000000e+00 : f32
    %18 = vector.broadcast %cst_7 : f32 to vector<16x128xf32>
    %19 = arith.subf %18, %3 : vector<16x128xf32>
    %cst_8 = arith.constant 0.000000e+00 : f32
    %20 = vector.broadcast %cst_8 : f32 to vector<16x128xf32>
    %21 = arith.maximumf %19, %20 : vector<16x128xf32>
    %22 = arith.addf %17, %21 : vector<16x128xf32>
    %23 = arith.mulf %9, %22 : vector<16x128xf32>
    %24 = arith.addf %12, %23 : vector<16x128xf32>
    %c0_9 = arith.constant 0 : index
    %c0_10 = arith.constant 0 : index
    %25 = vector.load %arg4[%c0_9, %c0_10] : memref<16x128xf32, #tpu.memory_space<vmem>>, vector<16x128xf32>
    %26 = vector.shape_cast %24 : vector<16x128xf32> to vector<1x16x128xf32>
    %cst_11 = arith.constant dense<0.000000e+00> : vector<16x128xf32>
    %27 = vector.multi_reduction <add>, %26, %cst_11 [0] : vector<1x16x128xf32> to vector<16x128xf32>
    %28 = arith.addf %25, %27 : vector<16x128xf32>
    %c0_12 = arith.constant 0 : index
    %c0_13 = arith.constant 0 : index
    %29 = vector.load %arg4[%c0_12, %c0_13] : memref<16x128xf32, #tpu.memory_space<vmem>>, vector<16x128xf32>
    tpu.vector_store %arg4[%c0_12, %c0_13], %28 {strides = array<i32>} : memref<16x128xf32, #tpu.memory_space<vmem>>, vector<16x128xf32>,
    return
  }
  func.func @transform_0(%arg0: i32, %arg1: memref<1xf32, #tpu.memory_space<smem>>) -> (i32, i32) {
    %c0_i32 = arith.constant 0 : i32
    %c0_i32_0 = arith.constant 0 : i32
    return %arg0, %c0_i32 : i32, i32
  }
  func.func @transform_1(%arg0: i32, %arg1: memref<1xf32, #tpu.memory_space<smem>>) -> (i32, i32) {
    %c0_i32 = arith.constant 0 : i32
    %c0_i32_0 = arith.constant 0 : i32
    return %arg0, %c0_i32 : i32, i32
  }
  func.func @transform_2(%arg0: i32, %arg1: memref<1xf32, #tpu.memory_space<smem>>) -> (i32, i32) {
    %c0_i32 = arith.constant 0 : i32
    %c0_i32_0 = arith.constant 0 : i32
    %c0_i32_1 = arith.constant 0 : i32
    return %c0_i32, %c0_i32_0 : i32, i32
  }
}

</mosaic_0001>

<bundles_post_ra>
// kernel: tpu_custom_call.1
= control target key start
LH: loop header
LB: loop body
LE: loop exit
PB: predicated region body
PF: predicated region fallthrough
CT: control target
= control target key end

     0   :  { %9 = vsyncpa [#allocation5], 0  ;;  %s283_s0 = inlined_call_operand.<no memory space> [shape: f32[1], index: 0, kind: input, shape index: {}]   ;;  %s284_s1 = inlined_call_operand.hbm [shape: f32[16,128], index: 1, kind: input, shape index: {}]   ;;  %s285_s2 = inlined_call_operand.hbm [shape: f32[16,128], index: 2, kind: input, shape index: {}]   ;;  %s286_s3 = inlined_call_operand.hbm [shape: f32[16,128], index: 3, kind: output, shape index: {}]  }
   0x1   :  { %10 = vsyncpa [#allocation8], 0 }
   0x2   :  { %11 = vsyncpa [#allocation6], 0  ;;  %s210_s12 = smov [#allocation4]   ;;  %s138_s16 = scalar_lea.hbm %s284_s1, 256 }
   0x3   :  { %s17_s13 = sshll.u32 %s210_s12, 4  ;;  %p139_p0 = scmp.ne.s32.totalorder %s284_s1, %s138_s16  ;;  %s18_s13 = int_to_ptr.vmem [resolvable:$true] %s17_s13 }
   0x4   :  { %p142_p1 = scmp.lt.u32.totalorder %s138_s16, %s284_s1 }
   0x6   :  { %p144_p2 = pnand %p142_p1, %p139_p0 }
   0x8   :  { %147 = shalt.err (!%p144_p2)
}
   0x9   :  { %s148_s21 = scalar_lea.vmem %s18_s13, 256  ;;  %p153_p4 = scmp.lt.s32.totalorder %s18_s13, %s18_s13 }
   0xa   :  { %p149_p3 = scmp.ne.s32.totalorder %s18_s13, %s148_s21  ;;  %p154_p5 = scmp.lt.s32.totalorder %s148_s21, %s148_s21 }
   0xc   :  { %p155_p6 = por %p154_p5, %p153_p4 }
   0xe   :  { %p156_p7 = pnand %p155_p6, %p149_p3 }
  0x10   :  { %159 = shalt.err (!%p156_p7)
}
  0x11   :  { %s211_s22 = smov 128   ;;  %s212_s23 = smov 8  }
  0x12   :  { %23 = dma.hbm_to_vmem [thread:$0]  %s284_s1, 256, %s18_s13, [#allocation5], %s211_s22, %s211_s22, %s212_s23  }
  0x13   :  { %s213_s26 = smov [#allocation7]   ;;  %s160_s30 = scalar_lea.hbm %s285_s2, 256 }
  0x14   :  { %s29_s27 = sshll.u32 %s213_s26, 4  ;;  %p161_p8 = scmp.ne.s32.totalorder %s285_s2, %s160_s30  ;;  %s30_s27 = int_to_ptr.vmem [resolvable:$true] %s29_s27 }
  0x15   :  { %p164_p9 = scmp.lt.u32.totalorder %s160_s30, %s285_s2 }
  0x17   :  { %p166_p10 = pnand %p164_p9, %p161_p8 }
  0x19   :  { %169 = shalt.err (!%p166_p10)
}
  0x1a   :  { %s170_s8 = scalar_lea.vmem %s30_s27, 256  ;;  %p175_p12 = scmp.lt.s32.totalorder %s30_s27, %s30_s27 }
  0x1b   :  { %p171_p11 = scmp.ne.s32.totalorder %s30_s27, %s170_s8  ;;  %p176_p13 = scmp.lt.s32.totalorder %s170_s8, %s170_s8 }
  0x1d   :  { %p177_p0 = por %p176_p13, %p175_p12 }
  0x1f   :  { %p178_p1 = pnand %p177_p0, %p171_p11 }
  0x21   :  { %181 = shalt.err (!%p178_p1)
}
  0x22   :  { %35 = dma.hbm_to_vmem [thread:$0]  %s285_s2, 256, %s30_s27, [#allocation8], %s211_s22, %s211_s22, %s212_s23  }
  0x23   :  { %204 = dma.done.wait [#allocation5], 256  }
  0x24   :  { %205 = vsyncadd [#allocation5], 4294967040 }
  0x25   :  { %206 = dma.done.wait [#allocation8], 256  }
  0x26   :  { %207 = vsyncadd [#allocation8], 4294967040  ;;  %v48_v0 = vld [vmem:[#allocation4] sm:$0xff]  ;;  %v49_v1 = vld [vmem:[#allocation4 + $0x8] sm:$0xff]  ;;  %v53_v15 = vstv %s283_s0  ;;  %s214_s0 = smov [#allocation9]  }
  0x27   :  { %v62_v2 = vand.u32 2147483647, %v48_v0  ;;  %v63_v3 = vand.u32 2147483647, %v49_v1  ;;  %v50_v14 = vld [vmem:[#allocation7] sm:$0xff]  ;;  %v88_v18 = vsub.f32 0.0, %v48_v0 }
  0x28   :  { %v51_v19 = vld [vmem:[#allocation7 + $0x8] sm:$0xff]  ;;  %v89_v22 = vsub.f32 0.0, %v49_v1  ;;  %v54_v23 = vmul.f32 %v53_v15, %v50_v14  ;;  %v58_v27 = vsub.f32 1.0, %v50_v14  ;;  %s111_s11 = sshll.u32 %s214_s0, 4  ;;  %s112_s11 = int_to_ptr.vmem [resolvable:$true] %s111_s11 }
  0x29   :  { %v64_v4 = vsub.f32 0.0, %v62_v2  ;;  %v65_v5 = vsub.f32 0.0, %v63_v3  ;;  %v55_v25 = vmul.f32 %v53_v15, %v51_v19  ;;  %v90_v28 = vmax.f32 %v88_v18, 0.0  ;;  %s182_s12 = scalar_lea.vmem %s112_s11, 256  ;;  %p187_p3 = scmp.lt.s32.totalorder %s112_s11, %s112_s11 }
  0x2a   :  { %v59_v32 = vsub.f32 1.0, %v51_v19  ;;  %v91_v33 = vmax.f32 %v89_v22, 0.0  ;;  %v56_v34 = vadd.f32 1.0, %v54_v23  ;;  %v60_v38 = vmul.f32 %v58_v27, %v48_v0  ;;  %p183_p2 = scmp.ne.s32.totalorder %s112_s11, %s182_s12  ;;  %p188_p4 = scmp.lt.s32.totalorder %s182_s12, %s182_s12 }
  0x2b   :  { %v66_v6 = vmul.f32 1.442695, %v64_v4  ;;  %v68_v7 = vmul.f32 1.442695, %v65_v5  ;;  %v57_v37 = vadd.f32 1.0, %v55_v25 }
  0x2c   :  { %v61_v41 = vmul.f32 %v59_v32, %v49_v1  ;;  %p189_p5 = por %p188_p4, %p187_p3 }
  0x2d   :  { %130 = vpow2.f32 %v66_v6 }
  0x2e   :  { %132 = vpow2.f32 %v68_v7  ;;  %p190_p6 = pnand %p189_p5, %p183_p2 }
  0x37   :  { %v131_v8 = vpop.eup %130 }
  0x38   :  { %v133_v9 = vpop.eup %132  ;;  %v70_v10 = vadd.f32 1.0, %v131_v8  ;;  %v73_v12 = vmul.f32 -0.5, %v131_v8  ;;  %v76_v17 = vand.u32 2147483647, %v131_v8 }
  0x39   :  { %v79_v11 = vadd.f32 1.0, %v133_v9  ;;  %v82_v13 = vmul.f32 -0.5, %v133_v9  ;;  %v85_v21 = vand.u32 2147483647, %v133_v9 }
  0x3a   :  { %134 = vlog2.f32 %v70_v10  ;;  %v74_v16 = vadd.f32 1.0, %v73_v12  ;;  %vm77_vm0 = vcmp.lt.f32.partialorder %v76_v17, 0.0004427343 }
  0x3b   :  { %136 = vlog2.f32 %v79_v11  ;;  %v83_v20 = vadd.f32 1.0, %v82_v13  ;;  %vm86_vm1 = vcmp.lt.f32.partialorder %v85_v21, 0.0004427343 }
  0x3c   :  { %v75_v24 = vmul.f32 %v131_v8, %v74_v16 }
  0x3d   :  { %v84_v29 = vmul.f32 %v133_v9, %v83_v20 }
  0x44   :  { %v135_v26 = vpop.eup %134 }
  0x45   :  { %v137_v30 = vpop.eup %136  ;;  %v72_v31 = vmul.f32 0.6931472, %v135_v26 }
  0x46   :  { %v81_v35 = vmul.f32 0.6931472, %v137_v30 }
  0x47   :  { %v78_v36 = vsel %vm77_vm0, %v75_v24, %v72_v31 }
  0x48   :  { %v92_v39 = vadd.f32 %v90_v28, %v78_v36  ;;  %v87_v40 = vsel %vm86_vm1, %v84_v29, %v81_v35 }
  0x49   :  { %v93_v42 = vadd.f32 %v91_v33, %v87_v40 }
  0x4a   :  { %v94_v43 = vmul.f32 %v92_v39, %v56_v34 }
  0x4b   :  { %v95_v44 = vmul.f32 %v93_v42, %v57_v37 }
  0x4c   :  { %v96_v45 = vadd.f32 %v94_v43, %v60_v38 }
  0x4d   :  { %v97_v46 = vadd.f32 %v95_v44, %v61_v41 }
  0x4e   :  { %104 = vst [vmem:[#allocation9] sm:$0xff] %v96_v45 }
  0x4f   :  { %105 = vst [vmem:[#allocation9 + $0x8] sm:$0xff] %v97_v46 }
  0x50   :  { %193 = shalt.err (!%p190_p6)
}
  0x51   :  { %s194_s15 = scalar_lea.hbm %s286_s3, 256 }
  0x52   :  { %p195_p7 = scmp.ne.s32.totalorder %s286_s3, %s194_s15  ;;  %p198_p8 = scmp.lt.u32.totalorder %s194_s15, %s286_s3 }
  0x54   :  { %p200_p9 = pnand %p198_p8, %p195_p7 }
  0x56   :  { %203 = shalt.err (!%p200_p9)
}
  0x57   :  { %117 = dma.vmem_to_hbm [thread:$0]  %s112_s11, 256, %s286_s3, [#allocation6], %s211_s22, %s211_s22, %s212_s23  }
  0x58   :  { %208 = dma.done.wait [#allocation6], 256  }
  0x59   :  { %209 = vsyncadd [#allocation6], 4294967040 }
  0x5a   :  { %121 = vsyncpa [#allocation5], 1 }
  0x5b   :  { %122 = vsyncpa [#allocation8], 1 }
  0x5c   :  { %123 = vsyncpa [#allocation6], 1 }

</bundles_post_ra>
